<compile_context>
chip_gen: v5e
topology: v5e:2x2
jax: 0.10.0
libtpu: 0.0.40
codegen_flags: <defaults>
</compile_context>

<pallas_src>
import functools
import math

import jax
import jax.numpy as jnp
from jax import lax
from jax.experimental import pallas as pl
from jax.experimental.pallas import tpu as pltpu

EPS = 1e-5
NEG_SLOPE = 0.2
LANE = 128


def _round_up(x, m):
    return ((x + m - 1) // m) * m


def _vmem_capacity_bytes():
    """Trace-time VMEM capacity query with a safe fallback."""
    try:
        info = pltpu.get_tpu_info()
        cap = getattr(info, "vmem_capacity_bytes", None)
        if cap:
            return int(cap)
    except Exception:
        pass
    return 128 * 1024 * 1024


def _pick_row_tile(m_flat, wp, k_dim, tn, in_itemsize, y_itemsize, vmem_budget):
    """Row tile for pass 1 over the flattened (N*Ho*Wp) pixel axis.

    Must be a multiple of lcm(8, Wp): 8 for sublane alignment, Wp so each tile
    covers whole image rows (the roll-based dw==1 realign needs the wrap row
    to land in the junk column).
    """
    base = (8 * wp) // math.gcd(8, wp)
    # per-row VMEM: double-buffered input + output rows, plus ~3 full-width
    # f32 intermediates (acc0, acc1, masked acc) inside the kernel.
    row_cost = 2 * k_dim * in_itemsize + 2 * tn * y_itemsize + 3 * tn * 4
    budget_rows = max(base, vmem_budget // max(1, row_cost))
    tb = base * max(1, budget_rows // base)
    n_base = -(-m_flat // base)
    if n_base >= 2:
        # keep at least 2 row tiles so the "parallel" axis can shard (megacore)
        tb = min(tb, base * (-(-n_base // 2)))
    else:
        tb = base
    return tb


def _pick_pass2_tile(tb, n1, cout_pad, y_itemsize, vmem_budget):
    """Pass-2 row tile = tb * k, k the largest divisor of n1 that fits VMEM."""
    row_cost = 2 * cout_pad * (y_itemsize + 4)      # double-buffered in + out
    target_rows = max(tb, vmem_budget // max(1, row_cost))
    k = 1
    for d in range(min(n1, max(1, target_rows // tb)), 0, -1):
        if n1 % d == 0:
            k = d
            break
    return tb * k, n1 // k


def _make_conv_stats_kernel(tb, wp, m_valid, row_axis):
    """Pass 1: conv tile (2 wide MXU matmuls + 1 roll) + BN partial stats."""
    wo = wp - 1

    def kernel(x_ref, w_ref, y_ref, sum_ref, sq_ref):
        # x_ref: (tb, 8*Cin)  w_ref: (2, 8*Cin, tn)
        # y_ref: (tb, tn)     sum_ref/sq_ref: (8, tn)
        xs = x_ref[...]
        acc0 = jnp.dot(xs, w_ref[0], preferred_element_type=jnp.float32)
        acc1 = jnp.dot(xs, w_ref[1], preferred_element_type=jnp.float32)
        # dw == 1 taps need the pixel-axis neighbour (+1 along the row-major
        # width-Wp layout): roll by -1.  The wrap-around row is always the
        # junk column because tb % Wp == 0 (asserted host-side).
        acc = acc0 + pltpu.roll(acc1, tb - 1, 0)

        # Mask junk column / padded rows once; both the stored tile and the
        # BN statistics use the masked accumulator.
        row0 = pl.program_id(row_axis) * tb
        g = row0 + lax.broadcasted_iota(jnp.int32, (tb, 1), 0)
        valid = jnp.logical_and((g % wp) != wo, g < m_valid)
        acc = acc * valid.astype(jnp.float32)

        y_ref[...] = acc.astype(y_ref.dtype)
        sum_ref[...] = jnp.broadcast_to(
            jnp.sum(acc, axis=0, keepdims=True), sum_ref.shape)
        sq_ref[...] = jnp.broadcast_to(
            jnp.sum(acc * acc, axis=0, keepdims=True), sq_ref.shape)

    return kernel


def _norm_lrelu_kernel(y_ref, a_ref, b_ref, o_ref):
    """Pass 2: y_hat = y * inv_std - mean * inv_std, then LeakyReLU(0.2)."""
    z = y_ref[...].astype(jnp.float32) * a_ref[...] + b_ref[...]
    o_ref[...] = jnp.where(z >= 0, z, NEG_SLOPE * z)


@functools.partial(jax.jit, static_argnames=("compute_dtype",))
def down_forward(x_nchw, weight, compute_dtype=jnp.bfloat16):
    """x_nchw: (N, Cin, H, W); weight: (Cout, Cin, 4, 4).  Returns NCHW f32."""
    N, Cin, H, W = x_nchw.shape
    Cout = weight.shape[0]
    assert H % 2 == 0 and W % 2 == 0
    Ho, Wo = H // 2, W // 2
    Wp = Wo + 1                                    # width incl. 1 junk column
    cout_pad = _round_up(max(Cout, LANE), LANE)    # lane-dense output channels
    K = 8 * Cin                                    # 8 tap slots packed into K
    tn = 256 if (cout_pad > 256 and cout_pad % 256 == 0) else cout_pad
    n_ct = cout_pad // tn

    compute_dtype = jnp.dtype(compute_dtype)
    y_dtype = (jnp.bfloat16 if compute_dtype == jnp.dtype(jnp.bfloat16)
               else jnp.float32)
    in_itemsize = compute_dtype.itemsize
    y_itemsize = jnp.dtype(y_dtype).itemsize

    vmem_cap = _vmem_capacity_bytes()
    vmem_limit = (40 << 20) if vmem_cap <= (64 << 20) else (96 << 20)

    # ---- glue: NCHW -> NHWC, pad, 8 tap slots packed along K ---------------
    # TODO(synk): keep activations NHWC across Down blocks / fold the tap-slot
    # extraction into the kernel to avoid this extra HBM materialization and
    # the final output relayout.
    x = jnp.transpose(x_nchw, (0, 2, 3, 1)).astype(compute_dtype)
    x_pad = jnp.pad(x, ((0, 0), (1, 1), (1, 1), (0, 0)))    # conv padding = 1
    w_hwio = jnp.transpose(weight, (2, 3, 1, 0))            # (4, 4, Cin, Cout)

    m_flat = N * Ho * Wp
    slots, w0, w1 = [], [], []
    for kh in range(4):                # row shift
        for c in range(2):             # column parity
            xs = x_pad[:, kh:kh + 2 * Ho:2, c::2, :]        # (N, Ho, Wp, Cin)
            slots.append(xs.reshape(m_flat, Cin))
            w0.append(w_hwio[kh, c])          # dw = 0 -> kw = c
            w1.append(w_hwio[kh, c + 2])      # dw = 1 -> kw = c + 2
    x_cat = jnp.concatenate(slots, axis=1)                  # (m_flat, 8*Cin)
    w_pack = jnp.stack([jnp.concatenate(w0, 0),
                        jnp.concatenate(w1, 0)], 0).astype(compute_dtype)
    if cout_pad > Cout:                                     # (2, 8*Cin, cout_pad)
        w_pack = jnp.pad(w_pack, ((0, 0), (0, 0), (0, cout_pad - Cout)))

    tb = _pick_row_tile(m_flat, Wp, K, tn, in_itemsize, y_itemsize,
                        vmem_limit // 3)
    assert tb % Wp == 0 and tb % 8 == 0     # roll wrap-around correctness
    n1 = -(-m_flat // tb)
    m_pad = n1 * tb
    if m_pad > m_flat:
        x_cat = jnp.pad(x_cat, ((0, m_pad - m_flat), (0, 0)))

    # ---- pass 1: conv tiles + partial BN stats ------------------------------
    conv_kernel = _make_conv_stats_kernel(tb, Wp, m_flat, row_axis=1)
    flops = 4 * m_pad * K * cout_pad
    bytes_accessed = (n_ct * m_pad * K * in_itemsize
                      + 2 * K * cout_pad * in_itemsize
                      + m_pad * cout_pad * y_itemsize
                      + 2 * n1 * 8 * cout_pad * 4)
    y_flat, psum, psq = pl.pallas_call(
        conv_kernel,
        out_shape=(
            jax.ShapeDtypeStruct((m_pad, cout_pad), y_dtype),
            jax.ShapeDtypeStruct((n1, 8, cout_pad), jnp.float32),
            jax.ShapeDtypeStruct((n1, 8, cout_pad), jnp.float32),
        ),
        grid=(n_ct, n1),                     # channel tile outer, row tile inner
        in_specs=[
            pl.BlockSpec((tb, K), lambda j, i: (i, 0)),
            pl.BlockSpec((2, K, tn), lambda j, i: (0, 0, j)),
        ],
        out_specs=(
            pl.BlockSpec((tb, tn), lambda j, i: (i, j)),
            pl.BlockSpec((None, 8, tn), lambda j, i: (i, 0, j)),
            pl.BlockSpec((None, 8, tn), lambda j, i: (i, 0, j)),
        ),
        compiler_params=pltpu.CompilerParams(
            dimension_semantics=("parallel", "parallel"),
            vmem_limit_bytes=vmem_limit),
        cost_estimate=pl.CostEstimate(flops=flops, transcendentals=0,
                                      bytes_accessed=bytes_accessed),
    )(x_cat, w_pack)

    # ---- tiny reduction: global per-channel mean / inv_std ------------------
    # NOTE: one-pass E[x^2]-E[x]^2 variance in f32, clamped at 0.
    count = float(N * Ho * Wo)
    tot = jnp.sum(psum[:, 0, :], axis=0)
    tot2 = jnp.sum(psq[:, 0, :], axis=0)
    mean = tot / count
    var = jnp.maximum(tot2 / count - mean * mean, 0.0)
    inv_std = lax.rsqrt(var + EPS)                 # once per channel
    a = inv_std.reshape(1, cout_pad)
    b = (-mean * inv_std).reshape(1, cout_pad)

    # ---- pass 2: streaming normalize + LeakyReLU (big row tiles) -----------
    tb2, n2 = _pick_pass2_tile(tb, n1, cout_pad, y_itemsize, vmem_limit // 3)
    out_flat = pl.pallas_call(
        _norm_lrelu_kernel,
        out_shape=jax.ShapeDtypeStruct((m_pad, cout_pad), jnp.float32),
        grid=(n2,),
        in_specs=[
            pl.BlockSpec((tb2, cout_pad), lambda i: (i, 0)),
            pl.BlockSpec((1, cout_pad), lambda i: (0, 0)),
            pl.BlockSpec((1, cout_pad), lambda i: (0, 0)),
        ],
        out_specs=pl.BlockSpec((tb2, cout_pad), lambda i: (i, 0)),
        compiler_params=pltpu.CompilerParams(
            dimension_semantics=("parallel",),
            vmem_limit_bytes=vmem_limit),
    )(y_flat, a, b)

    # strip junk column / row padding / channel padding, back to NCHW
    out = out_flat[:m_flat].reshape(N, Ho, Wp, cout_pad)[:, :, :Wo, :Cout]
    return jnp.transpose(out, (0, 3, 1, 2))


def _reference(x_nchw, weight):
    """Pure-JAX reference (conv -> training-mode BN -> LeakyReLU)."""
    y = lax.conv_general_dilated(
        x_nchw, weight, window_strides=(2, 2), padding=((1, 1), (1, 1)),
        dimension_numbers=("NCHW", "OIHW", "NCHW"))
    mean = jnp.mean(y, axis=(0, 2, 3), keepdims=True)
    var = jnp.mean((y - mean) ** 2, axis=(0, 2, 3), keepdims=True)
    y_hat = (y - mean) / jnp.sqrt(var + EPS)
    return jnp.where(y_hat >= 0, y_hat, NEG_SLOPE * y_hat)


if __name__ == "__main__":
    key = jax.random.PRNGKey(0)
    k_x, k_w = jax.random.split(key)

    N, Cin, Cout, H, W = 2, 4, 8, 16, 16
    x = jax.random.normal(k_x, (N, Cin, H, W), dtype=jnp.float32)
    weight = 0.1 * jax.random.normal(k_w, (Cout, Cin, 4, 4), dtype=jnp.float32)

    # f32 operands: strict check against the pure-JAX reference.
    out_f32 = jax.block_until_ready(down_forward(x, weight,
                                                 compute_dtype=jnp.float32))
    ref = _reference(x, weight)
    assert out_f32.shape == (N, Cout, H // 2, W // 2)
    assert jnp.allclose(out_f32, ref, atol=1e-4, rtol=1e-4), "f32 mismatch"

    # default bf16 MXU operands (f32 accumulation / f32 epilogue, bf16 conv
    # intermediate): compare against a reference fed bf16-rounded operands.
    out_bf16 = jax.block_until_ready(down_forward(x, weight))
    x_q = x.astype(jnp.bfloat16).astype(jnp.float32)
    w_q = weight.astype(jnp.bfloat16).astype(jnp.float32)
    ref_bf16 = _reference(x_q, w_q)
    assert jnp.allclose(out_bf16, ref_bf16, atol=1e-2, rtol=1e-2), "bf16 mismatch"

    print("KERNEL_OK")
</pallas_src>

<mosaic_0001>
module attributes {stable_mosaic.version = 11 : i64} {
  func.func @_norm_lrelu_kernel(%arg0: i32, %arg1: memref<144x128xf32, #tpu.memory_space<vmem>>, %arg2: memref<1x128xf32, #tpu.memory_space<vmem>>, %arg3: memref<1x128xf32, #tpu.memory_space<vmem>>, %arg4: memref<144x128xf32, #tpu.memory_space<vmem>>) attributes {dimension_semantics = [#tpu.dimension_semantics<parallel>], iteration_bounds = array<i64: 1>, scalar_prefetch = 0 : i64, scratch_operands = 0 : i64, tpu.core_type = #tpu.core_type<tc>, window_params = [{transform_indices = @transform_0, window_bounds = array<i64: 144, 128>}, {pipeline_mode = #tpu.pipeline_mode<synchronous>, transform_indices = @transform_1, window_bounds = array<i64: 1, 128>}, {pipeline_mode = #tpu.pipeline_mode<synchronous>, transform_indices = @transform_2, window_bounds = array<i64: 1, 128>}, {transform_indices = @transform_3, window_bounds = array<i64: 144, 128>}]} {
    %c0 = arith.constant 0 : index
    %c0_0 = arith.constant 0 : index
    %0 = vector.load %arg1[%c0, %c0_0] : memref<144x128xf32, #tpu.memory_space<vmem>>, vector<144x128xf32>
    %c0_1 = arith.constant 0 : index
    %c0_2 = arith.constant 0 : index
    %1 = vector.load %arg2[%c0_1, %c0_2] : memref<1x128xf32, #tpu.memory_space<vmem>>, vector<1x128xf32>
    %2 = vector.broadcast %1 : vector<1x128xf32> to vector<144x128xf32>
    %3 = arith.mulf %0, %2 : vector<144x128xf32>
    %c0_3 = arith.constant 0 : index
    %c0_4 = arith.constant 0 : index
    %4 = vector.load %arg3[%c0_3, %c0_4] : memref<1x128xf32, #tpu.memory_space<vmem>>, vector<1x128xf32>
    %5 = vector.broadcast %4 : vector<1x128xf32> to vector<144x128xf32>
    %6 = arith.addf %3, %5 : vector<144x128xf32>
    %cst = arith.constant 0.000000e+00 : f32
    %7 = vector.broadcast %cst : f32 to vector<144x128xf32>
    %8 = arith.cmpf oge, %6, %7 : vector<144x128xf32>
    %cst_5 = arith.constant 2.000000e-01 : f32
    %9 = vector.broadcast %cst_5 : f32 to vector<144x128xf32>
    %10 = arith.mulf %9, %6 : vector<144x128xf32>
    %11 = arith.select %8, %6, %10 : vector<144x128xi1>, vector<144x128xf32>
    %c0_6 = arith.constant 0 : index
    %c0_7 = arith.constant 0 : index
    %12 = vector.load %arg4[%c0_6, %c0_7] : memref<144x128xf32, #tpu.memory_space<vmem>>, vector<144x128xf32>
    tpu.vector_store %arg4[%c0_6, %c0_7], %11 {strides = array<i32>} : memref<144x128xf32, #tpu.memory_space<vmem>>, vector<144x128xf32>,
    return
  }
  func.func @transform_0(%arg0: i32) -> (i32, i32) {
    %c0_i32 = arith.constant 0 : i32
    %c0_i32_0 = arith.constant 0 : i32
    return %arg0, %c0_i32 : i32, i32
  }
  func.func @transform_1(%arg0: i32) -> (i32, i32) {
    %c0_i32 = arith.constant 0 : i32
    %c0_i32_0 = arith.constant 0 : i32
    %c0_i32_1 = arith.constant 0 : i32
    return %c0_i32, %c0_i32_0 : i32, i32
  }
  func.func @transform_2(%arg0: i32) -> (i32, i32) {
    %c0_i32 = arith.constant 0 : i32
    %c0_i32_0 = arith.constant 0 : i32
    %c0_i32_1 = arith.constant 0 : i32
    return %c0_i32, %c0_i32_0 : i32, i32
  }
  func.func @transform_3(%arg0: i32) -> (i32, i32) {
    %c0_i32 = arith.constant 0 : i32
    %c0_i32_0 = arith.constant 0 : i32
    return %arg0, %c0_i32 : i32, i32
  }
}

module attributes {stable_mosaic.version = 11 : i64} {
  func.func @kernel(%arg0: i32, %arg1: i32, %arg2: memref<72x32xf32, #tpu.memory_space<vmem>>, %arg3: memref<2x32x128xf32, #tpu.memory_space<vmem>>, %arg4: memref<72x128xf32, #tpu.memory_space<vmem>>, %arg5: memref<1x8x128xf32, #tpu.memory_space<vmem>>, %arg6: memref<1x8x128xf32, #tpu.memory_space<vmem>>) attributes {dimension_semantics = [#tpu.dimension_semantics<parallel>, #tpu.dimension_semantics<parallel>], iteration_bounds = array<i64: 1, 2>, scalar_prefetch = 0 : i64, scratch_operands = 0 : i64, tpu.core_type = #tpu.core_type<tc>, window_params = [{transform_indices = @transform_0, window_bounds = array<i64: 72, 32>}, {transform_indices = @transform_1, window_bounds = array<i64: 2, 32, 128>}, {transform_indices = @transform_2, window_bounds = array<i64: 72, 128>}, {transform_indices = @transform_3, window_bounds = array<i64: 1, 8, 128>}, {transform_indices = @transform_4, window_bounds = array<i64: 1, 8, 128>}]} {
    %c0 = arith.constant 0 : index
    %c0_0 = arith.constant 0 : index
    %0 = vector.load %arg2[%c0, %c0_0] : memref<72x32xf32, #tpu.memory_space<vmem>>, vector<72x32xf32>
    %c0_1 = arith.constant 0 : index
    %c0_2 = arith.constant 0 : index
    %c0_3 = arith.constant 0 : index
    %1 = vector.load %arg3[%c0_1, %c0_2, %c0_3] : memref<2x32x128xf32, #tpu.memory_space<vmem>>, vector<1x32x128xf32>
    %2 = vector.shape_cast %1 : vector<1x32x128xf32> to vector<32x128xf32>
    %cst = arith.constant dense<0.000000e+00> : vector<72x128xf32>
    %3 = tpu.matmul %0, %2, %cst {dimension_numbers = #tpu.dot_dimension_numbers<[1], [0], [0], [1], [0, 0, 1, 1], [], []>} : vector<72x32xf32>, vector<32x128xf32>, vector<72x128xf32> -> vector<72x128xf32>
    %c1 = arith.constant 1 : index
    %c0_4 = arith.constant 0 : index
    %c0_5 = arith.constant 0 : index
    %4 = vector.load %arg3[%c1, %c0_4, %c0_5] : memref<2x32x128xf32, #tpu.memory_space<vmem>>, vector<1x32x128xf32>
    %5 = vector.shape_cast %4 : vector<1x32x128xf32> to vector<32x128xf32>
    %cst_6 = arith.constant dense<0.000000e+00> : vector<72x128xf32>
    %6 = tpu.matmul %0, %5, %cst_6 {dimension_numbers = #tpu.dot_dimension_numbers<[1], [0], [0], [1], [0, 0, 1, 1], [], []>} : vector<72x32xf32>, vector<32x128xf32>, vector<72x128xf32> -> vector<72x128xf32>
    %c71_i32 = arith.constant 71 : i32
    %7 = tpu.dynamic_rotate %6 by %c71_i32 dim 0 : vector<72x128xf32>, i32 -> vector<72x128xf32>
    %8 = arith.addf %3, %7 : vector<72x128xf32>
    %c72_i32 = arith.constant 72 : i32
    %9 = arith.muli %arg1, %c72_i32 : i32
    %10 = tpu.iota {dimensions = array<i32: 0>} : vector<72x1xi32>
    %11 = vector.broadcast %9 : i32 to vector<72x1xi32>
    %12 = arith.addi %11, %10 : vector<72x1xi32>
    %c9_i32 = arith.constant 9 : i32
    %c0_i32 = arith.constant 0 : i32
    %13 = arith.cmpi eq, %c9_i32, %c0_i32 : i32
    %c1_i32 = arith.constant 1 : i32
    %14 = arith.select %13, %c1_i32, %c9_i32 : i32
    %15 = vector.broadcast %14 : i32 to vector<72x1xi32>
    %16 = arith.remsi %12, %15 : vector<72x1xi32>
    %c0_i32_7 = arith.constant 0 : i32
    %17 = vector.broadcast %c0_i32_7 : i32 to vector<72x1xi32>
    %18 = arith.cmpi ne, %16, %17 : vector<72x1xi32>
    %c0_i32_8 = arith.constant 0 : i32
    %19 = vector.broadcast %c0_i32_8 : i32 to vector<72x1xi32>
    %20 = arith.cmpi slt, %16, %19 : vector<72x1xi32>
    %c0_i32_9 = arith.constant 0 : i32
    %21 = arith.cmpi slt, %14, %c0_i32_9 : i32
    %22 = vector.broadcast %21 : i1 to vector<72x1xi1>
    %23 = vector.broadcast %22 : vector<72x1xi1> to vector<72x1xi1>
    %24 = arith.xori %20, %23 : vector<72x1xi1>
    %25 = arith.andi %24, %18 : vector<72x1xi1>
    %26 = vector.broadcast %14 : i32 to vector<72x1xi32>
    %27 = arith.addi %16, %26 : vector<72x1xi32>
    %28 = arith.select %25, %27, %16 : vector<72x1xi1>, vector<72x1xi32>
    %c8_i32 = arith.constant 8 : i32
    %29 = vector.broadcast %c8_i32 : i32 to vector<72x1xi32>
    %30 = arith.cmpi ne, %28, %29 : vector<72x1xi32>
    %c144_i32 = arith.constant 144 : i32
    %31 = vector.broadcast %c144_i32 : i32 to vector<72x1xi32>
    %32 = arith.cmpi slt, %12, %31 : vector<72x1xi32>
    %33 = arith.andi %30, %32 : vector<72x1xi1>
    %34 = arith.extui %33 : vector<72x1xi1> to vector<72x1xi32>
    %35 = arith.sitofp %34 : vector<72x1xi32> to vector<72x1xf32>
    %36 = vector.broadcast %35 : vector<72x1xf32> to vector<72x128xf32>
    %37 = arith.mulf %8, %36 : vector<72x128xf32>
    %c0_10 = arith.constant 0 : index
    %c0_11 = arith.constant 0 : index
    %38 = vector.load %arg4[%c0_10, %c0_11] : memref<72x128xf32, #tpu.memory_space<vmem>>, vector<72x128xf32>
    tpu.vector_store %arg4[%c0_10, %c0_11], %37 {strides = array<i32>} : memref<72x128xf32, #tpu.memory_space<vmem>>, vector<72x128xf32>,
    %cst_12 = arith.constant dense<0.000000e+00> : vector<128xf32>
    %39 = vector.multi_reduction <add>, %37, %cst_12 [0] : vector<72x128xf32> to vector<128xf32>
    %40 = vector.shape_cast %39 : vector<128xf32> to vector<1x128xf32>
    %41 = vector.shape_cast %40 : vector<1x128xf32> to vector<1x128xf32>
    %42 = vector.broadcast %41 : vector<1x128xf32> to vector<8x128xf32>
    %c0_13 = arith.constant 0 : index
    %c0_14 = arith.constant 0 : index
    %c0_15 = arith.constant 0 : index
    %43 = vector.load %arg5[%c0_13, %c0_14, %c0_15] : memref<1x8x128xf32, #tpu.memory_space<vmem>>, vector<1x8x128xf32>
    %44 = vector.shape_cast %43 : vector<1x8x128xf32> to vector<8x128xf32>
    %45 = vector.shape_cast %42 : vector<8x128xf32> to vector<1x8x128xf32>
    tpu.vector_store %arg5[%c0_13, %c0_14, %c0_15], %45 {strides = array<i32>} : memref<1x8x128xf32, #tpu.memory_space<vmem>>, vector<1x8x128xf32>,
    %46 = arith.mulf %37, %37 : vector<72x128xf32>
    %cst_16 = arith.constant dense<0.000000e+00> : vector<128xf32>
    %47 = vector.multi_reduction <add>, %46, %cst_16 [0] : vector<72x128xf32> to vector<128xf32>
    %48 = vector.shape_cast %47 : vector<128xf32> to vector<1x128xf32>
    %49 = vector.shape_cast %48 : vector<1x128xf32> to vector<1x128xf32>
    %50 = vector.broadcast %49 : vector<1x128xf32> to vector<8x128xf32>
    %c0_17 = arith.constant 0 : index
    %c0_18 = arith.constant 0 : index
    %c0_19 = arith.constant 0 : index
    %51 = vector.load %arg6[%c0_17, %c0_18, %c0_19] : memref<1x8x128xf32, #tpu.memory_space<vmem>>, vector<1x8x128xf32>
    %52 = vector.shape_cast %51 : vector<1x8x128xf32> to vector<8x128xf32>
    %53 = vector.shape_cast %50 : vector<8x128xf32> to vector<1x8x128xf32>
    tpu.vector_store %arg6[%c0_17, %c0_18, %c0_19], %53 {strides = array<i32>} : memref<1x8x128xf32, #tpu.memory_space<vmem>>, vector<1x8x128xf32>,
    return
  }
  func.func @transform_0(%arg0: i32, %arg1: i32) -> (i32, i32) {
    %c0_i32 = arith.constant 0 : i32
    %c0_i32_0 = arith.constant 0 : i32
    return %arg1, %c0_i32 : i32, i32
  }
  func.func @transform_1(%arg0: i32, %arg1: i32) -> (i32, i32, i32) {
    %c0_i32 = arith.constant 0 : i32
    %c0_i32_0 = arith.constant 0 : i32
    %c0_i32_1 = arith.constant 0 : i32
    return %c0_i32, %c0_i32_0, %arg0 : i32, i32, i32
  }
  func.func @transform_2(%arg0: i32, %arg1: i32) -> (i32, i32) {
    %c0_i32 = arith.constant 0 : i32
    return %arg1, %arg0 : i32, i32
  }
  func.func @transform_3(%arg0: i32, %arg1: i32) -> (i32, i32, i32) {
    %c0_i32 = arith.constant 0 : i32
    %c0_i32_0 = arith.constant 0 : i32
    return %arg1, %c0_i32, %arg0 : i32, i32, i32
  }
  func.func @transform_4(%arg0: i32, %arg1: i32) -> (i32, i32, i32) {
    %c0_i32 = arith.constant 0 : i32
    %c0_i32_0 = arith.constant 0 : i32
    return %arg1, %c0_i32, %arg0 : i32, i32, i32
  }
}

</mosaic_0001>

<bundles_post_ra>
// kernel: down_forward.3
= control target key start
LH: loop header
LB: loop body
LE: loop exit
PB: predicated region body
PF: predicated region fallthrough
CT: control target
= control target key end

     0   :  { %s329_s0 = inlined_call_operand.vmem [shape: f32[144,128], index: 0, kind: input, shape index: {}]   ;;  %s330_s1 = inlined_call_operand.vmem [shape: f32[1,128], index: 1, kind: input, shape index: {}]   ;;  %s331_s2 = inlined_call_operand.vmem [shape: f32[1,128], index: 2, kind: input, shape index: {}]   ;;  %s332_s3 = inlined_call_operand.vmem [shape: f32[144,128], index: 3, kind: output, shape index: {}]  }
   0x1   :  { %v14_v0 = vld [vmem:[%s329_s0] sm:$0xff]  ;;  %v15_v3 = vld [vmem:[%s329_s0 + $0x8] sm:$0xff]  ;;  %v16_v6 = vld [vmem:[%s329_s0 + $0x10] sm:$0xff] }
   0x2   :  { %v180_v1 = vld [vmem:[%s330_s1] ss:$0 sm:$0xff]  ;;  %v17_v7 = vld [vmem:[%s329_s0 + $0x18] sm:$0xff]  ;;  %v19_v12 = vld [vmem:[%s329_s0 + $0x28] sm:$0xff] }
   0x3   :  { %v185_v2 = vld [vmem:[%s331_s2] ss:$0 sm:$0xff]  ;;  %v36_v4 = vmul.f32 %v180_v1, %v14_v0  ;;  %v37_v5 = vmul.f32 %v180_v1, %v15_v3  ;;  %v38_v9 = vmul.f32 %v180_v1, %v16_v6  ;;  %v39_v10 = vmul.f32 %v180_v1, %v17_v7  ;;  %v20_v13 = vld [vmem:[%s329_s0 + $0x30] sm:$0xff]  ;;  %v21_v14 = vld [vmem:[%s329_s0 + $0x38] sm:$0xff] }
   0x4   :  { %v18_v8 = vld [vmem:[%s329_s0 + $0x20] sm:$0xff]  ;;  %v41_v17 = vmul.f32 %v180_v1, %v19_v12  ;;  %v42_v18 = vmul.f32 %v180_v1, %v20_v13  ;;  %v43_v22 = vmul.f32 %v180_v1, %v21_v14  ;;  %v23_v24 = vld [vmem:[%s329_s0 + $0x48] sm:$0xff]  ;;  %v24_v32 = vld [vmem:[%s329_s0 + $0x50] sm:$0xff] }
   0x5   :  { %v40_v11 = vmul.f32 %v180_v1, %v18_v8  ;;  %v58_v15 = vadd.f32 %v185_v2, %v36_v4  ;;  %v59_v16 = vadd.f32 %v185_v2, %v37_v5  ;;  %v60_v19 = vadd.f32 %v185_v2, %v38_v9  ;;  %v22_v23 = vld [vmem:[%s329_s0 + $0x40] sm:$0xff]  ;;  %v25_v41 = vld [vmem:[%s329_s0 + $0x58] sm:$0xff]  ;;  %v27_v52 = vld [vmem:[%s329_s0 + $0x68] sm:$0xff] }
   0x6   :  { %v61_v20 = vadd.f32 %v185_v2, %v39_v10  ;;  %v63_v35 = vadd.f32 %v185_v2, %v41_v17  ;;  %v64_v36 = vadd.f32 %v185_v2, %v42_v18  ;;  %v65_v38 = vadd.f32 %v185_v2, %v43_v22  ;;  %v26_v51 = vld [vmem:[%s329_s0 + $0x60] sm:$0xff]  ;;  %v28_v56 = vld [vmem:[%s329_s0 + $0x70] sm:$0xff]  ;;  %v29_v59 = vld [vmem:[%s329_s0 + $0x78] sm:$0xff] }
   0x7   :  { %v62_v21 = vadd.f32 %v185_v2, %v40_v11  ;;  %vm76_vm0 = vcmp.ge.f32.partialorder %v58_v15, 0.0  ;;  %v94_v25 = vmul.f32 0.2, %v58_v15  ;;  %vm77_vm1 = vcmp.ge.f32.partialorder %v59_v16, 0.0  ;;  %v30_v0 = vld [vmem:[%s329_s0 + $0x80] sm:$0xff]  ;;  %v31_v3 = vld [vmem:[%s329_s0 + $0x88] sm:$0xff] }
   0x8   :  { %v95_v26 = vmul.f32 0.2, %v59_v16  ;;  %vm78_vm2 = vcmp.ge.f32.partialorder %v60_v19, 0.0  ;;  %v96_v27 = vmul.f32 0.2, %v60_v19  ;;  %vm79_vm3 = vcmp.ge.f32.partialorder %v61_v20, 0.0 }
   0x9   :  { %v97_v28 = vmul.f32 0.2, %v61_v20  ;;  %v112_v29 = vsel %vm76_vm0, %v58_v15, %v94_v25  ;;  %vm80_vm4 = vcmp.ge.f32.partialorder %v62_v21, 0.0  ;;  %v98_v31 = vmul.f32 0.2, %v62_v21 }
   0xa   :  { %v113_v30 = vsel %vm77_vm1, %v59_v16, %v95_v26  ;;  %130 = vst [vmem:[%s332_s3] sm:$0xff] %v112_v29  ;;  %v114_v33 = vsel %vm78_vm2, %v60_v19, %v96_v27  ;;  %v44_v39 = vmul.f32 %v180_v1, %v22_v23  ;;  %v45_v40 = vmul.f32 %v180_v1, %v23_v24 }
   0xb   :  { %v115_v34 = vsel %vm79_vm3, %v61_v20, %v97_v28  ;;  %131 = vst [vmem:[%s332_s3 + $0x8] sm:$0xff] %v113_v30  ;;  %v116_v37 = vsel %vm80_vm4, %v62_v21, %v98_v31  ;;  %vm81_vm5 = vcmp.ge.f32.partialorder %v63_v35, 0.0  ;;  %v99_v42 = vmul.f32 0.2, %v63_v35 }
   0xc   :  { %132 = vst [vmem:[%s332_s3 + $0x10] sm:$0xff] %v114_v33  ;;  %vm82_vm6 = vcmp.ge.f32.partialorder %v64_v36, 0.0  ;;  %v46_v43 = vmul.f32 %v180_v1, %v24_v32  ;;  %v100_v44 = vmul.f32 0.2, %v64_v36  ;;  %vm83_vm7 = vcmp.ge.f32.partialorder %v65_v38, 0.0 }
   0xd   :  { %133 = vst [vmem:[%s332_s3 + $0x18] sm:$0xff] %v115_v34  ;;  %v101_v45 = vmul.f32 0.2, %v65_v38  ;;  %v66_v46 = vadd.f32 %v185_v2, %v44_v39  ;;  %v117_v47 = vsel %vm81_vm5, %v63_v35, %v99_v42  ;;  %v67_v48 = vadd.f32 %v185_v2, %v45_v40 }
   0xe   :  { %134 = vst [vmem:[%s332_s3 + $0x20] sm:$0xff] %v116_v37  ;;  %v68_v49 = vadd.f32 %v185_v2, %v46_v43  ;;  %v47_v50 = vmul.f32 %v180_v1, %v25_v41  ;;  %v118_v53 = vsel %vm82_vm6, %v64_v36, %v100_v44  ;;  %v48_v62 = vmul.f32 %v180_v1, %v26_v51 }
   0xf   :  { %135 = vst [vmem:[%s332_s3 + $0x28] sm:$0xff] %v117_v47  ;;  %v119_v54 = vsel %vm83_vm7, %v65_v38, %v101_v45  ;;  %vm84_vm8 = vcmp.ge.f32.partialorder %v66_v46, 0.0  ;;  %v102_v55 = vmul.f32 0.2, %v66_v46  ;;  %vm85_vm9 = vcmp.ge.f32.partialorder %v67_v48, 0.0 }
  0x10   :  { %136 = vst [vmem:[%s332_s3 + $0x30] sm:$0xff] %v118_v53  ;;  %v103_v57 = vmul.f32 0.2, %v67_v48  ;;  %vm86_vm10 = vcmp.ge.f32.partialorder %v68_v49, 0.0  ;;  %v69_v58 = vadd.f32 %v185_v2, %v47_v50  ;;  %v104_v61 = vmul.f32 0.2, %v68_v49 }
  0x11   :  { %137 = vst [vmem:[%s332_s3 + $0x38] sm:$0xff] %v119_v54  ;;  %v120_v60 = vsel %vm84_vm8, %v66_v46, %v102_v55  ;;  %v49_v63 = vmul.f32 %v180_v1, %v27_v52  ;;  %v50_v6 = vmul.f32 %v180_v1, %v28_v56  ;;  %v70_v8 = vadd.f32 %v185_v2, %v48_v62 }
  0x12   :  { %138 = vst [vmem:[%s332_s3 + $0x40] sm:$0xff] %v120_v60  ;;  %v121_v4 = vsel %vm85_vm9, %v67_v48, %v103_v57  ;;  %vm87_vm11 = vcmp.ge.f32.partialorder %v69_v58, 0.0  ;;  %v105_v5 = vmul.f32 0.2, %v69_v58  ;;  %v122_v7 = vsel %vm86_vm10, %v68_v49, %v104_v61 }
  0x13   :  { %139 = vst [vmem:[%s332_s3 + $0x48] sm:$0xff] %v121_v4  ;;  %v71_v9 = vadd.f32 %v185_v2, %v49_v63  ;;  %v51_v10 = vmul.f32 %v180_v1, %v29_v59  ;;  %v72_v12 = vadd.f32 %v185_v2, %v50_v6  ;;  %v52_v13 = vmul.f32 %v180_v1, %v30_v0 }
  0x14   :  { %140 = vst [vmem:[%s332_s3 + $0x50] sm:$0xff] %v122_v7  ;;  %v123_v11 = vsel %vm87_vm11, %v69_v58, %v105_v5  ;;  %v53_v14 = vmul.f32 %v180_v1, %v31_v3  ;;  %vm88_vm12 = vcmp.ge.f32.partialorder %v70_v8, 0.0  ;;  %v106_v15 = vmul.f32 0.2, %v70_v8 }
  0x15   :  { %141 = vst [vmem:[%s332_s3 + $0x58] sm:$0xff] %v123_v11  ;;  %vm89_vm13 = vcmp.ge.f32.partialorder %v71_v9, 0.0  ;;  %v73_v16 = vadd.f32 %v185_v2, %v51_v10  ;;  %v107_v17 = vmul.f32 0.2, %v71_v9  ;;  %vm90_vm14 = vcmp.ge.f32.partialorder %v72_v12, 0.0 }
  0x16   :  { %v108_v18 = vmul.f32 0.2, %v72_v12  ;;  %v74_v19 = vadd.f32 %v185_v2, %v52_v13  ;;  %v124_v20 = vsel %vm88_vm12, %v70_v8, %v106_v15  ;;  %v75_v22 = vadd.f32 %v185_v2, %v53_v14 }
  0x17   :  { %vm91_vm15 = vcmp.ge.f32.partialorder %v73_v16, 0.0  ;;  %v109_v21 = vmul.f32 0.2, %v73_v16  ;;  %142 = vst [vmem:[%s332_s3 + $0x60] sm:$0xff] %v124_v20  ;;  %v125_v1 = vsel %vm89_vm13, %v71_v9, %v107_v17 }
  0x18   :  { %v126_v23 = vsel %vm90_vm14, %v72_v12, %v108_v18  ;;  %vm92_vm0 = vcmp.ge.f32.partialorder %v74_v19, 0.0  ;;  %v110_v24 = vmul.f32 0.2, %v74_v19  ;;  %143 = vst [vmem:[%s332_s3 + $0x68] sm:$0xff] %v125_v1  ;;  %vm93_vm1 = vcmp.ge.f32.partialorder %v75_v22, 0.0 }
  0x19   :  { %v127_v25 = vsel %vm91_vm15, %v73_v16, %v109_v21  ;;  %v111_v26 = vmul.f32 0.2, %v75_v22  ;;  %144 = vst [vmem:[%s332_s3 + $0x70] sm:$0xff] %v126_v23 }
  0x1a   :  { %v128_v2 = vsel %vm92_vm0, %v74_v19, %v110_v24  ;;  %145 = vst [vmem:[%s332_s3 + $0x78] sm:$0xff] %v127_v25 }
  0x1b   :  { %v129_v27 = vsel %vm93_vm1, %v75_v22, %v111_v26  ;;  %146 = vst [vmem:[%s332_s3 + $0x80] sm:$0xff] %v128_v2 }
  0x1c   :  { %147 = vst [vmem:[%s332_s3 + $0x88] sm:$0xff] %v129_v27 }

// kernel: down_forward.2
= control target key start
LH: loop header
LB: loop body
LE: loop exit
PB: predicated region body
PF: predicated region fallthrough
CT: control target
= control target key end

     0   :  { %s1157_s15 = smov 0   ;;  %s1159_s16 = smov 0   ;;  %s1648_s0 = inlined_call_operand.vmem [shape: f32[144,32], index: 0, kind: input, shape index: {}]   ;;  %s1649_s1 = inlined_call_operand.vmem [shape: f32[2,32,128], index: 1, kind: input, shape index: {}]   ;;  %s1650_s2 = inlined_call_operand.vmem [shape: f32[144,128], index: 2, kind: output, shape index: {0}]   ;;  %s1651_s3 = inlined_call_operand.vmem [shape: f32[2,8,128], index: 3, kind: output, shape index: {1}]   ;;  %s1652_s4 = inlined_call_operand.vmem [shape: f32[2,8,128], index: 4, kind: output, shape index: {2}]  }
   0x1   :  { %s1161_s17 = smov 0  }
   0x2 LB: > { %s24_s18 = sadd.s32 1, %s1124_s16  ;;  %p1034_p0 = scmp.ge.s32.totalorder %s1128_s17, 1  ;;  %s1128_s17 = sphi %s1161_s17, %s15_s17   ;;  %s1124_s16 = sphi %s1159_s16, %s1686_s16   ;;  %s1120_s15 = sphi %s1157_s15, %s1685_s15  }
   0x3   : > { %p25_p1 = scmp.ge.s32.totalorder %s24_s18, 2  ;;  %p195_p2 = scmp.lt.s32.totalorder %s1128_s17, 3 }
   0x5   : > { %s1688_s18 = smov (%p25_p1, %s24_s18), 0  ;;  %p196_p3 = pnand %p1034_p0, %p195_p2 }
   0x6   : > { %s242_s25 = smul.u32 (!%p196_p3), 9, %s1120_s15  ;;  %p261_p5 = scmp.lt.s32.totalorder (!%p196_p3), %s1120_s15, 1 }
   0x7   : > { %199 = sbr.rel (%p196_p3) target bundleno = 230 (0xe6), region = 28 }
   0x8   : > { %p243_p4 = scmp.lt.s32.totalorder (!%p196_p3), %s242_s25, 17  ;;  %s430_s14 = smul.u32 (!%p196_p3), 72, %s1120_s15 }
   0xc   : > { %v1042_v0 = vld [vmem:[%s1649_s1 + $0x38] sm:$0xff]  ;;  %v1041_v1 = vld [vmem:[%s1649_s1 + $0x30] sm:$0xff]  ;;  %v1040_v4 = vld [vmem:[%s1649_s1 + $0x28] sm:$0xff]  ;;  %s1690_s25 = smov (!%p243_p4, %s242_s25), 17  ;;  %vm293_vm0 = vcmask 261120   ;;  %v374_v17 = vlaneseq  ;;  %v1231_v19 = vstv %s430_s14  ;;  %v1130_v37 = vmov 0  }
   0xd   : > { %v287_v2 = vld [vmem:[%s1649_s1 + $0x18] sm:$0xff]  ;;  %333 = vmatpush.msra.mxu0 %v1042_v0  ;;  %1072 = vmatpush.msra.mxu2 %v1042_v0  ;;  %v286_v3 = vld [vmem:[%s1649_s1 + $0x10] sm:$0xff]  ;;  %v285_v5 = vld [vmem:[%s1649_s1 + $0x8] sm:$0xff]  ;;  %s1035_s10 = sshll.u32 %s1690_s25, 3  ;;  %s1692_s15 = smov (!%p261_p5, %s1120_s15), 1 }
   0xe   : > { %398 = vmatpush.msra.mxu1 %v287_v2  ;;  %1076 = vmatpush.msra.mxu3 %v287_v2  ;;  %v1039_v6 = vld [vmem:[%s1649_s1 + $0x20] sm:$0xff]  ;;  %s246_s13 = scalar_lea.vmem %s1648_s0, %s1035_s10  ;;  %v1229_v18 = vshrl.u32 %v374_v17, 7  ;;  %s1467_s21 = scalar_lea.vmem %s1650_s2, %s1035_s10 }
   0xf   : > { %334 = vmatpush.msra.mxu0 %v1041_v1  ;;  %1073 = vmatpush.msra.mxu2 %v1041_v1  ;;  %v284_v7 = vld [vmem:[%s1649_s1] sm:$0xff]  ;;  %v280_v9 = vld [vmem:[%s246_s13 + $0x28] sm:$0xff]  ;;  %v281_v11 = vld [vmem:[%s246_s13 + $0x30] sm:$0xff]  ;;  %s1037_s22 = sshll.u32 %s1692_s15, 3 }
  0x10   : > { %399 = vmatpush.msra.mxu1 %v286_v3  ;;  %1077 = vmatpush.msra.mxu3 %v286_v3  ;;  %v275_v8 = vld [vmem:[%s246_s13] sm:$0xff]  ;;  %v276_v10 = vld [vmem:[%s246_s13 + $0x8] sm:$0xff]  ;;  %v277_v12 = vld [vmem:[%s246_s13 + $0x10] sm:$0xff]  ;;  %v1235_v20 = vadd.s32 %v1231_v19, %v1229_v18  ;;  %v435_v24 = vadd.s32 40, %v1229_v18  ;;  %v431_v25 = vadd.s32 8, %v1229_v18  ;;  %v436_v45 = vadd.s32 48, %v1229_v18  ;;  %s267_s25 = scalar_lea.vmem %s1651_s3, %s1037_s22  ;;  %s274_s28 = scalar_lea.vmem %s1652_s4, %s1037_s22 }
  0x11   : > { %335 = vmatpush.msra.mxu0 %v1040_v4  ;;  %1074 = vmatpush.msra.mxu2 %v1040_v4  ;;  %v282_v13 = vld [vmem:[%s246_s13 + $0x38] sm:$0xff]  ;;  %v283_v15 = vld [vmem:[%s246_s13 + $0x40] sm:$0xff] }
  0x12   : > { %400 = vmatpush.msra.mxu1 %v285_v5  ;;  %1078 = vmatpush.msra.mxu3 %v285_v5  ;;  %v278_v14 = vld [vmem:[%s246_s13 + $0x18] sm:$0xff]  ;;  %v279_v16 = vld [vmem:[%s246_s13 + $0x20] sm:$0xff]  ;;  %v450_v21 = vsub.s32 0, %v1235_v20  ;;  %vm449_vm1 = vcmp.lt.s32.totalorder %v1235_v20, 0  ;;  %v1249_v28 = vadd.s32 %v1231_v19, %v435_v24  ;;  %v1252_v29 = vadd.s32 %v1231_v19, %v431_v25 }
  0x13   : > { %336 = vmatpush.msra.mxu0 %v1039_v6  ;;  %1075 = vmatpush.msra.mxu2 %v1039_v6  ;;  %v1276_v53 = vadd.s32 %v1231_v19, %v436_v45 }
  0x14   : > { %401 = vmatpush.msra.mxu1 %v284_v7  ;;  %1079 = vmatpush.msra.mxu3 %v284_v7  ;;  %v1242_v22 = vsel %vm449_vm1, %v450_v21, %v1235_v20  ;;  %v595_v33 = vsub.s32 0, %v1249_v28  ;;  %v479_v34 = vsub.s32 0, %v1252_v29  ;;  %vm594_vm3 = vcmp.lt.s32.totalorder %v1249_v28, 0 }
  0x15   : > { %1043 = vmatmul.msk.f32.vlgmr.msra.gmra.mxu0 %vm293_vm0, %v275_v8  ;;  %1048 = vmatmul.msk.f32.vlgmr.msra.gmra.mxu2 %vm293_vm0, %v280_v9  ;;  %v452_v23 = vand.u32 65535, %v1242_v22  ;;  %v453_v26 = vshrl.u32 %v1242_v22, 16  ;;  %vm478_vm4 = vcmp.lt.s32.totalorder %v1252_v29, 0  ;;  %vm623_vm6 = vcmp.lt.s32.totalorder %v1276_v53, 0 }
  0x16   : > { %1052 = vmatmul.msk.f32.vlgmr.msra.gmra.mxu1 %vm293_vm0, %v275_v8  ;;  %1057 = vmatmul.msk.f32.vlgmr.msra.gmra.mxu3 %vm293_vm0, %v280_v9  ;;  %v1262_v41 = vsel %vm594_vm3, %v595_v33, %v1249_v28  ;;  %v1267_v42 = vsel %vm478_vm4, %v479_v34, %v1252_v29  ;;  %v624_v6 = vsub.s32 0, %v1276_v53 }
  0x17   : > { %v456_v27 = vmul.u32 58254, %v452_v23  ;;  %v455_v30 = vmul.u32 14564, %v452_v23  ;;  %v457_v31 = vmul.u32 14564, %v453_v26  ;;  %v458_v35 = vmul.u32 58254, %v453_v26 }
  0x18   : > { %v597_v43 = vand.u32 65535, %v1262_v41  ;;  %v481_v44 = vand.u32 65535, %v1267_v42  ;;  %v598_v48 = vshrl.u32 %v1262_v41, 16  ;;  %v482_v49 = vshrl.u32 %v1267_v42, 16 }
  0x19   : > { %v459_v32 = vshll.u32 %v456_v27, 16  ;;  %v461_v36 = vshll.u32 %v457_v31, 16  ;;  %v460_v46 = vshrl.u32 %v456_v27, 16  ;;  %v462_v54 = vshrl.u32 %v457_v31, 16 }
  0x1a   : > { %v601_v51 = vmul.u32 58254, %v597_v43  ;;  %v485_v52 = vmul.u32 58254, %v481_v44  ;;  %v600_v55 = vmul.u32 14564, %v597_v43  ;;  %v602_v56 = vmul.u32 14564, %v598_v48 }
  0x1b   : > { %vm463_vm2 = vc.u32 %v455_v30, %v459_v32  ;;  %v465_v39 = vadd.s32 %v459_v32, %v455_v30  ;;  %v484_v57 = vmul.u32 14564, %v481_v44  ;;  %v486_v60 = vmul.u32 14564, %v482_v49 }
  0x1c   : > { %v464_v38 = vsel %vm463_vm2, 1, %v1130_v37  ;;  %v604_v59 = vshll.u32 %v601_v51, 16  ;;  %v488_v61 = vshll.u32 %v485_v52, 16  ;;  %v603_v62 = vmul.u32 58254, %v598_v48 }
  0x1d   : > { %1044 = vmatmul.msk.f32.gmra.mxu0 %vm293_vm0, %v276_v10  ;;  %1049 = vmatmul.msk.f32.gmra.mxu2 %vm293_vm0, %v281_v11  ;;  %v466_v40 = vadd.s32 %v464_v38, %v458_v35  ;;  %vm467_vm5 = vc.u32 %v465_v39, %v461_v36  ;;  %v606_v63 = vshll.u32 %v602_v56, 16  ;;  %v487_v0 = vmul.u32 58254, %v482_v49 }
  0x1e   : > { %1053 = vmatmul.msk.f32.gmra.mxu1 %vm293_vm0, %v276_v10  ;;  %1058 = vmatmul.msk.f32.gmra.mxu3 %vm293_vm0, %v281_v11  ;;  %v468_v47 = vsel %vm467_vm5, 1, %v1130_v37  ;;  %vm608_vm7 = vc.u32 %v600_v55, %v604_v59  ;;  %v610_v2 = vadd.s32 %v604_v59, %v600_v55  ;;  %v490_v3 = vshll.u32 %v486_v60, 16 }
  0x1f   : > { %v470_v50 = vadd.s32 %v468_v47, %v466_v40  ;;  %v609_v4 = vsel %vm608_vm7, 1, %v1130_v37  ;;  %vm492_vm8 = vc.u32 %v484_v57, %v488_v61  ;;  %v494_v5 = vadd.s32 %v488_v61, %v484_v57 }
  0x20   : > { %v611_v8 = vadd.s32 %v609_v4, %v603_v62  ;;  %vm612_vm9 = vc.u32 %v610_v2, %v606_v63  ;;  %v493_v9 = vsel %vm492_vm8, 1, %v1130_v37  ;;  %v605_v10 = vshrl.u32 %v601_v51, 16 }
  0x21   : > { %v471_v58 = vadd.s32 %v470_v50, %v460_v46  ;;  %v613_v11 = vsel %vm612_vm9, 1, %v1130_v37  ;;  %vm496_vm10 = vc.u32 %v494_v5, %v490_v3  ;;  %v607_v17 = vshrl.u32 %v602_v56, 16 }
  0x22   : > { %v491_v21 = vshrl.u32 %v486_v60, 16  ;;  %v497_v23 = vsel %vm496_vm10, 1, %v1130_v37  ;;  %v432_v32 = vadd.s32 16, %v1229_v18  ;;  %v437_v40 = vadd.s32 56, %v1229_v18 }
  0x23   : > { %v472_v1 = vadd.s32 %v471_v58, %v462_v54  ;;  %vm764_vm10 = vcmp.lt.s32.totalorder %v1235_v20, 144 }
  0x24   : > { %v1297_v46 = vadd.s32 %v1231_v19, %v432_v32  ;;  %v1301_v51 = vadd.s32 %v1231_v19, %v437_v40 }
  0x25   : > { %1045 = vmatmul.msk.f32.gmra.mxu0 %vm293_vm0, %v277_v12  ;;  %1050 = vmatmul.msk.f32.gmra.mxu2 %vm293_vm0, %v282_v13  ;;  %v473_v7 = vshrl.u32 %v472_v1, 3 }
  0x26   : > { %1054 = vmatmul.msk.f32.gmra.mxu1 %vm293_vm0, %v277_v12  ;;  %1059 = vmatmul.msk.f32.gmra.mxu3 %vm293_vm0, %v282_v13  ;;  %v489_v12 = vshrl.u32 %v485_v52, 16  ;;  %v495_v13 = vadd.s32 %v493_v9, %v487_v0  ;;  %vm507_vm14 = vcmp.lt.s32.totalorder %v1297_v46, 0  ;;  %v508_v57 = vsub.s32 0, %v1297_v46 }
  0x28   : > { %v499_v27 = vadd.s32 %v497_v23, %v495_v13  ;;  %v1310_v62 = vsel %vm507_vm14, %v508_v57, %v1297_v46 }
  0x29   : > { %v510_v2 = vand.u32 65535, %v1310_v62 }
  0x2a   : > { %v500_v35 = vadd.s32 %v499_v27, %v489_v12  ;;  %v433_v27 = vadd.s32 24, %v1229_v18 }
  0x2c   : > { %v501_v44 = vadd.s32 %v500_v35, %v491_v21  ;;  %v1367_v57 = vadd.s32 %v1231_v19, %v433_v27 }
  0x2d   : > { %1046 = vmatmul.msk.f32.gmra.mxu0 %vm293_vm0, %v278_v14  ;;  %1051 = vmatmul.msk.f32.gmra.mxu2 %vm293_vm0, %v283_v15 }
  0x2e   : > { %1055 = vmatmul.msk.f32.gmra.mxu1 %vm293_vm0, %v278_v14  ;;  %1060 = vmatmul.msk.f32.gmra.mxu3 %vm293_vm0, %v283_v15  ;;  %v474_v14 = vmul.u32 9, %v473_v7  ;;  %v615_v15 = vadd.s32 %v613_v11, %v611_v8  ;;  %v502_v48 = vshrl.u32 %v501_v44, 3  ;;  %v511_v8 = vshrl.u32 %v1310_v62, 16 }
  0x30   : > { %v475_v25 = vsub.s32 %v1242_v22, %v474_v14  ;;  %v616_v26 = vadd.s32 %v615_v15, %v605_v10  ;;  %v503_v54 = vmul.u32 9, %v502_v48  ;;  %v513_v10 = vmul.u32 14564, %v510_v2 }
  0x31   : > { %v514_v14 = vmul.u32 58254, %v510_v2 }
  0x32   : > { %v476_v33 = vsub.s32 0, %v475_v25  ;;  %v617_v34 = vadd.s32 %v616_v26, %v607_v17  ;;  %v504_v60 = vsub.s32 %v1267_v42, %v503_v54  ;;  %v515_v17 = vmul.u32 14564, %v511_v8 }
  0x33   : > { %v517_v26 = vshll.u32 %v514_v14, 16 }
  0x34   : > { %v618_v43 = vshrl.u32 %v617_v34, 3  ;;  %v477_v22 = vsel %vm449_vm1, %v476_v33, %v475_v25  ;;  %v505_v1 = vsub.s32 0, %v504_v60  ;;  %v516_v25 = vmul.u32 58254, %v511_v8 }
  0x35   : > { %1047 = vmatmul.msk.f32.gmra.mxu0 %vm293_vm0, %v279_v16  ;;  %vm710_vm12 = vcmp.ne.s32.totalorder %v477_v22, 0  ;;  %vm719_vm13 = vcmp.lt.s32.totalorder %v477_v22, 0  ;;  %v737_v58 = vadd.s32 9, %v477_v22  ;;  %v523_v35 = vadd.s32 %v517_v26, %v513_v10 }
  0x36   : > { %1056 = vmatmul.msk.f32.gmra.mxu1 %vm293_vm0, %v279_v16  ;;  %v1286_v16 = vsel %vm623_vm6, %v624_v6, %v1276_v53  ;;  %v619_v47 = vmul.u32 9, %v618_v43  ;;  %vm1314_vm0 = vmand %vm719_vm13, %vm710_vm12  ;;  %v506_v6 = vsel %vm478_vm4, %v505_v1, %v504_v60  ;;  %vm769_vm12 = vcmp.lt.s32.totalorder %v1249_v28, 144 }
  0x37   : > { %v626_v24 = vand.u32 65535, %v1286_v16  ;;  %v627_v30 = vshrl.u32 %v1286_v16, 16  ;;  %v746_v9 = vsel %vm1314_vm0, %v737_v58, %v477_v22  ;;  %vm711_vm7 = vcmp.ne.s32.totalorder %v506_v6, 0 }
  0x38   : > { %v620_v52 = vsub.s32 %v1262_v41, %v619_v47  ;;  %v653_v41 = vsub.s32 0, %v1301_v51  ;;  %vm720_vm8 = vcmp.lt.s32.totalorder %v506_v6, 0  ;;  %v738_v12 = vadd.s32 9, %v506_v6 }
  0x39   : > { %v630_v31 = vmul.u32 58254, %v626_v24  ;;  %v629_v36 = vmul.u32 14564, %v626_v24  ;;  %v631_v38 = vmul.u32 14564, %v627_v30  ;;  %v632_v45 = vmul.u32 58254, %v627_v30  ;;  %vm1334_vm9 = vmand %vm720_vm8, %vm711_vm7 }
  0x3a   : > { %v621_v59 = vsub.s32 0, %v620_v52  ;;  %vm1343_vm4 = vcmp.ne.s32.totalorder %v746_v9, 8  ;;  %v747_v33 = vsel %vm1334_vm9, %v738_v12, %v506_v6  ;;  %vm521_vm13 = vc.u32 %v513_v10, %v517_v26 }
  0x3b   : > { %v633_v39 = vshll.u32 %v630_v31, 16  ;;  %v635_v49 = vshll.u32 %v631_v38, 16  ;;  %v634_v61 = vshrl.u32 %v630_v31, 16  ;;  %v636_v7 = vshrl.u32 %v631_v38, 16  ;;  %vm1386_vm8 = vmand %vm1343_vm4, %vm764_vm10 }
  0x3c   : > { %v622_v0 = vsel %vm594_vm3, %v621_v59, %v620_v52  ;;  %vm652_vm3 = vcmp.lt.s32.totalorder %v1301_v51, 0  ;;  %v519_v31 = vshll.u32 %v515_v17, 16  ;;  %v522_v38 = vsel %vm521_vm13, 1, %v1130_v37 }
  0x3d   : > { %vm637_vm11 = vc.u32 %v629_v36, %v633_v39  ;;  %v639_v55 = vadd.s32 %v633_v39, %v629_v36  ;;  %vm715_vm1 = vcmp.ne.s32.totalorder %v622_v0, 0  ;;  %vm724_vm2 = vcmp.lt.s32.totalorder %v622_v0, 0 }
  0x3e   : > { %v638_v50 = vsel %vm637_vm11, 1, %v1130_v37  ;;  %v742_v3 = vadd.s32 9, %v622_v0  ;;  %vm1322_vm5 = vmand %vm724_vm2, %vm715_vm1  ;;  %v1341_v21 = vsel %vm652_vm3, %v653_v41, %v1301_v51  ;;  %v518_v36 = vshrl.u32 %v514_v14, 16 }
  0x3f   : > { %v640_v56 = vadd.s32 %v638_v50, %v632_v45  ;;  %vm641_vm15 = vc.u32 %v639_v55, %v635_v49  ;;  %v655_v32 = vand.u32 65535, %v1341_v21  ;;  %v656_v39 = vshrl.u32 %v1341_v21, 16 }
  0x40   : > { %v642_v42 = vsel %vm641_vm15, 1, %v1130_v37  ;;  %v751_v11 = vsel %vm1322_vm5, %v742_v3, %v622_v0  ;;  %v524_v44 = vadd.s32 %v522_v38, %v516_v25  ;;  %vm525_vm15 = vc.u32 %v523_v35, %v519_v31 }
  0x41   : > { %v644_v4 = vadd.s32 %v642_v42, %v640_v56  ;;  %vm1349_vm11 = vcmp.ne.s32.totalorder %v751_v11, 8  ;;  %v659_v40 = vmul.u32 58254, %v655_v32  ;;  %v658_v22 = vmul.u32 14564, %v655_v32 }
  0x42   : > { %vm765_vm0 = vcmp.lt.s32.totalorder %v1252_v29, 144  ;;  %v520_v45 = vshrl.u32 %v515_v17, 16  ;;  %v526_v47 = vsel %vm525_vm15, 1, %v1130_v37  ;;  %v660_v48 = vmul.u32 14564, %v656_v39 }
  0x43   : > { %v645_v13 = vadd.s32 %v644_v4, %v634_v61  ;;  %v528_v50 = vadd.s32 %v526_v47, %v524_v44  ;;  %v661_v52 = vmul.u32 58254, %v656_v39  ;;  %v662_v54 = vshll.u32 %v659_v40, 16 }
  0x44   : > { %vm1362_vm1 = vcmp.ne.s32.totalorder %v747_v33, 8  ;;  %v664_v56 = vshll.u32 %v660_v48, 16  ;;  %v438_v58 = vadd.s32 64, %v1229_v18  ;;  %vm536_vm5 = vcmp.lt.s32.totalorder %v1367_v57, 0 }
  0x45   : > { %v646_v24 = vadd.s32 %v645_v13, %v636_v7  ;;  %v529_v60 = vadd.s32 %v528_v50, %v518_v36  ;;  %vm666_vm2 = vc.u32 %v658_v22, %v662_v54  ;;  %v668_v61 = vadd.s32 %v662_v54, %v658_v22  ;;  %vm1410_vm4 = vmand %vm1362_vm1, %vm765_vm0 }
  0x46   : > { %v667_v41 = vsel %vm666_vm2, 1, %v1130_v37  ;;  %v1374_v63 = vadd.s32 %v1231_v19, %v438_v58  ;;  %v663_v4 = vshrl.u32 %v659_v40, 16  ;;  %v665_v6 = vshrl.u32 %v660_v48, 16 }
  0x47   : > { %v647_v34 = vshrl.u32 %v646_v24, 3  ;;  %v530_v42 = vadd.s32 %v529_v60, %v520_v45  ;;  %v669_v2 = vadd.s32 %v667_v41, %v661_v52  ;;  %vm670_vm7 = vc.u32 %v668_v61, %v664_v56 }
  0x48   : > { %v671_v7 = vsel %vm670_vm7, 1, %v1130_v37  ;;  %vm376_vm10 = vcmp.lt.s32.totalorder %v1229_v18, 7  ;;  %v1131_v13 = vmov 0.0   ;;  %v682_v33 = vsub.s32 0, %v1374_v63 }
  0x49   : > { %v648_v43 = vmul.u32 9, %v647_v34  ;;  %v531_v20 = vshrl.u32 %v530_v42, 3  ;;  %v673_v10 = vadd.s32 %v671_v7, %v669_v2  ;;  %v1061_v29 = vsel %vm1386_vm8, 1.0, %v1131_v13 }
  0x4a   : > { %v1440_v31 = vsel %vm1410_vm4, 1.0, %v1131_v13  ;;  %vm770_vm8 = vcmp.lt.s32.totalorder %v1276_v53, 144 }
  0x4b   : > { %v649_v49 = vsub.s32 %v1286_v16, %v648_v43  ;;  %v537_v16 = vsub.s32 0, %v1367_v57  ;;  %v532_v15 = vmul.u32 9, %v531_v20  ;;  %v674_v23 = vadd.s32 %v673_v10, %v663_v4 }
  0x4d   : > { %v650_v59 = vsub.s32 0, %v649_v49  ;;  %v1404_v8 = vsel %vm536_vm5, %v537_v16, %v1367_v57  ;;  %v533_v32 = vsub.s32 %v1310_v62, %v532_v15  ;;  %v675_v36 = vadd.s32 %v674_v23, %v665_v6 }
  0x4e   : > { %v539_v11 = vand.u32 65535, %v1404_v8  ;;  %v540_v12 = vshrl.u32 %v1404_v8, 16 }
  0x4f   : > { %v1380_v1 = vsel %vm623_vm6, %v650_v59, %v649_v49  ;;  %vm1396_vm6 = vmand %vm1349_vm11, %vm769_vm12  ;;  %vm681_vm12 = vcmp.lt.s32.totalorder %v1374_v63, 0  ;;  %v534_v40 = vsub.s32 0, %v533_v32  ;;  %v676_v45 = vshrl.u32 %v675_v36, 3 }
  0x50   : > { %vm716_vm9 = vcmp.ne.s32.totalorder %v1380_v1, 0  ;;  %vm725_vm13 = vcmp.lt.s32.totalorder %v1380_v1, 0  ;;  %v743_v9 = vadd.s32 9, %v1380_v1  ;;  %v542_v24 = vmul.u32 14564, %v539_v11 }
  0x51   : > { %vm1425_vm11 = vmand %vm725_vm13, %vm716_vm9  ;;  %v543_v25 = vmul.u32 58254, %v539_v11  ;;  %v544_v26 = vmul.u32 14564, %v540_v12  ;;  %v1435_v30 = vsel %vm1396_vm6, 1.0, %v1131_v13  ;;  %v545_v43 = vmul.u32 58254, %v540_v12 }
  0x52   : > { %v752_v35 = vsel %vm1425_vm11, %v743_v9, %v1380_v1  ;;  %v1451_v22 = vsel %vm681_vm12, %v682_v33, %v1374_v63  ;;  %v535_v49 = vsel %vm507_vm14, %v534_v40, %v533_v32  ;;  %v677_v59 = vmul.u32 9, %v676_v45 }
  0x53   : > { %v546_v38 = vshll.u32 %v543_v25, 16  ;;  %v548_v44 = vshll.u32 %v544_v26, 16  ;;  %v547_v50 = vshrl.u32 %v543_v25, 16  ;;  %v684_v54 = vand.u32 65535, %v1451_v22 }
  0x54   : > { %vm712_vm0 = vcmp.ne.s32.totalorder %v535_v49, 0  ;;  %vm721_vm1 = vcmp.lt.s32.totalorder %v535_v49, 0  ;;  %v685_v56 = vshrl.u32 %v1451_v22, 16  ;;  %v739_v41 = vadd.s32 9, %v535_v49 }
  0x55   : > { %vm550_vm15 = vc.u32 %v542_v24, %v546_v38  ;;  %v552_v47 = vadd.s32 %v546_v38, %v542_v24  ;;  %v1471_v1 = vmul.u32 58254, %v684_v54  ;;  %vm1475_vm14 = vmand %vm721_vm1, %vm712_vm0  ;;  %v678_v4 = vsub.s32 %v1341_v21, %v677_v59 }
  0x56   : > { %v551_v52 = vsel %vm550_vm15, 1, %v1130_v37  ;;  %v549_v5 = vshrl.u32 %v544_v26, 16  ;;  %vm1480_vm7 = vcmp.ne.s32.totalorder %v752_v35, 8  ;;  %v1485_v9 = vmul.u32 14564, %v685_v56 }
  0x57   : > { %v553_v60 = vadd.s32 %v551_v52, %v545_v43  ;;  %vm554_vm2 = vc.u32 %v552_v47, %v548_v44  ;;  %v679_v11 = vsub.s32 0, %v678_v4  ;;  %v691_v21 = vshll.u32 %v1471_v1, 16  ;;  %vm1512_vm4 = vmand %vm1480_vm7, %vm770_vm8 }
  0x58   : > { %v555_v16 = vsel %vm554_vm2, 1, %v1130_v37  ;;  %v690_v23 = vmul.u32 58254, %v685_v56  ;;  %v693_v32 = vshll.u32 %v1485_v9, 16  ;;  %vm766_vm15 = vcmp.lt.s32.totalorder %v1297_v46, 144 }
  0x59   : > { %v557_v20 = vadd.s32 %v555_v16, %v553_v60  ;;  %v680_v25 = vsel %vm652_vm3, %v679_v11, %v678_v4  ;;  %vm771_vm0 = vcmp.lt.s32.totalorder %v1301_v51, 144  ;;  %v694_v59 = vshrl.u32 %v1485_v9, 16 }
  0x5a   : > { %vm717_vm9 = vcmp.ne.s32.totalorder %v680_v25, 0  ;;  %vm726_vm13 = vcmp.lt.s32.totalorder %v680_v25, 0  ;;  %v744_v35 = vadd.s32 9, %v680_v25 }
  0x5b   : > { %v558_v12 = vadd.s32 %v557_v20, %v547_v50  ;;  %vm1504_vm6 = vmand %vm726_vm13, %vm717_vm9 }
  0x5d   : > { %v559_v26 = vadd.s32 %v558_v12, %v549_v5 }
  0x5f   : > { %v560_v43 = vshrl.u32 %v559_v26, 3 }
  0x92   : > { %v1376_v0 = vpop.f32.mrf.mxu0 }
  0x93   : > { %v403_v17 = vpop.f32.mrf.mxu1  ;;  %v365_v34 = vrot.slane %v1376_v0, 1 }
  0x98   : > { %v1430_v27 = vpop.f32.mrf.mxu2 }
  0x99   : > { %v418_v48 = vpop.f32.mrf.mxu3  ;;  %v370_v61 = vrot.slane %v1430_v27, 1 }
  0x9a   : > { %v341_v39 = vpop.f32.mrf.mxu0 }
  0x9b   : > { %v366_v62 = vrot.slane %v341_v39, 1  ;;  %v406_v6 = vpop.f32.mrf.mxu1 }
  0x9d   : > { %v384_v55 = vsel %vm376_vm10, %v365_v34, %v366_v62 }
  0x9e   : > { %v404_v58 = vadd.f32 %v403_v17, %v384_v55  ;;  %v748_v17 = vsel %vm1475_vm14, %v739_v41, %v535_v49  ;;  %v561_v49 = vmul.u32 9, %v560_v43  ;;  %v1067_v55 = vsel %vm1512_vm4, 1.0, %v1131_v13 }
  0x9f   : > { %vm1516_vm11 = vcmp.ne.s32.totalorder %v748_v17, 8 }
  0xa0   : > { %v1473_v42 = vmul.f32 %v1061_v29, %v404_v58  ;;  %v356_v2 = vpop.f32.mrf.mxu2  ;;  %v687_v29 = vmul.u32 14564, %v684_v54  ;;  %v434_v54 = vadd.s32 32, %v1229_v18  ;;  %vm775_vm2 = vmand %vm1516_vm11, %vm766_vm15  ;;  %v562_v56 = vsub.s32 %v1404_v8, %v561_v49 }
  0xa1   : > { %v371_v7 = vrot.slane %v356_v2, 1  ;;  %v421_v39 = vpop.f32.mrf.mxu3  ;;  %v692_v58 = vshrl.u32 %v1471_v1, 16  ;;  %v1063_v1 = vsel %vm775_vm2, 1.0, %v1131_v13  ;;  %vm772_vm2 = vcmp.lt.s32.totalorder %v1374_v63, 144 }
  0xa2   : > { %809 = vst [vmem:[%s1467_s21] sm:$0xff] %v1473_v42  ;;  %v344_v10 = vpop.f32.mrf.mxu0  ;;  %vm695_vm3 = vc.u32 %v687_v29, %v691_v21  ;;  %v697_v45 = vadd.s32 %v691_v21, %v687_v29  ;;  %v1547_v3 = vadd.s32 %v1231_v19, %v434_v54  ;;  %v563_v4 = vsub.s32 0, %v562_v56 }
  0xa3   : > { %v379_v14 = vsel %vm376_vm10, %v370_v61, %v371_v7  ;;  %v367_v15 = vrot.slane %v344_v10, 1  ;;  %v409_v60 = vpop.f32.mrf.mxu1 }
  0xa4   : > { %v419_v24 = vadd.f32 %v418_v48, %v379_v14  ;;  %v753_v48 = vsel %vm1504_vm6, %v744_v35, %v680_v25  ;;  %vm699_vm1 = vc.u32 %v697_v45, %v693_v32  ;;  %vm565_vm7 = vcmp.lt.s32.totalorder %v1547_v3, 0 }
  0xa5   : > { %v383_v33 = vsel %vm376_vm10, %v366_v62, %v367_v15  ;;  %v696_v62 = vsel %vm695_vm3, 1, %v1130_v37  ;;  %v700_v2 = vsel %vm699_vm1, 1, %v1130_v37  ;;  %vm762_vm14 = vcmp.ne.s32.totalorder %v753_v48, 8 }
  0xa6   : > { %v1502_v36 = vmul.f32 %v1435_v30, %v419_v24  ;;  %v407_v38 = vadd.f32 %v406_v6, %v383_v33  ;;  %v698_v52 = vadd.s32 %v696_v62, %v690_v23  ;;  %v566_v20 = vsub.s32 0, %v1547_v3  ;;  %vm1560_vm8 = vmand %vm762_vm14, %vm771_vm0 }
  0xa7   : > { %v564_v19 = vsel %vm536_vm5, %v563_v4, %v562_v56  ;;  %vm767_vm6 = vcmp.lt.s32.totalorder %v1367_v57, 144  ;;  %v1068_v32 = vsel %vm1560_vm8, 1.0, %v1131_v13 }
  0xa8   : > { %814 = vst [vmem:[%s1467_s21 + $0x28] sm:$0xff] %v1502_v36  ;;  %v1525_v53 = vmul.f32 %v1440_v31, %v407_v38  ;;  %v359_v47 = vpop.f32.mrf.mxu2  ;;  %v702_v5 = vadd.s32 %v700_v2, %v698_v52  ;;  %vm713_vm9 = vcmp.ne.s32.totalorder %v564_v19, 0  ;;  %vm722_vm13 = vcmp.lt.s32.totalorder %v564_v19, 0 }
  0xa9   : > { %v372_v50 = vrot.slane %v359_v47, 1  ;;  %v740_v10 = vadd.s32 9, %v564_v19  ;;  %v1567_v11 = vsel %vm565_vm7, %v566_v20, %v1547_v3  ;;  %v424_v29 = vpop.f32.mrf.mxu3  ;;  %vm731_vm5 = vmand %vm722_vm13, %vm713_vm9 }
  0xaa   : > { %810 = vst [vmem:[%s1467_s21 + $0x8] sm:$0xff] %v1525_v53  ;;  %v347_v31 = vpop.f32.mrf.mxu0  ;;  %v703_v28 = vadd.s32 %v702_v5, %v692_v58  ;;  %v568_v14 = vand.u32 65535, %v1567_v11  ;;  %v569_v23 = vshrl.u32 %v1567_v11, 16  ;;  %v818_v9 = vadd.f32 %v1525_v53, %v1473_v42 }
  0xab   : > { %v378_v41 = vsel %vm376_vm10, %v371_v7, %v372_v50  ;;  %v368_v16 = vrot.slane %v347_v31, 1  ;;  %v749_v17 = vsel %vm731_vm5, %v740_v10, %v564_v19  ;;  %v834_v19 = vmul.f32 %v1525_v53, %v1525_v53 }
  0xac   : > { %v422_v46 = vadd.f32 %v421_v39, %v378_v41  ;;  %v704_v51 = vadd.s32 %v703_v28, %v694_v59  ;;  %vm758_vm3 = vcmp.ne.s32.totalorder %v749_v17, 8  ;;  %v572_v33 = vmul.u32 58254, %v568_v14  ;;  %v412_v39 = vpop.f32.mrf.mxu1 }
  0xad   : > { %v382_v8 = vsel %vm376_vm10, %v367_v15, %v368_v16  ;;  %vm776_vm4 = vmand %vm758_vm3, %vm767_vm6  ;;  %v571_v44 = vmul.u32 14564, %v568_v14  ;;  %v573_v30 = vmul.u32 14564, %v569_v23  ;;  %v574_v48 = vmul.u32 58254, %v569_v23 }
  0xae   : > { %v1554_v6 = vmul.f32 %v1067_v55, %v422_v46  ;;  %v410_v7 = vadd.f32 %v409_v60, %v382_v8  ;;  %v705_v25 = vshrl.u32 %v704_v51, 3  ;;  %v1064_v43 = vsel %vm776_vm4, 1.0, %v1131_v13 }
  0xaf   : > { %v575_v49 = vshll.u32 %v572_v33, 16  ;;  %v577_v54 = vshll.u32 %v573_v30, 16  ;;  %v576_v41 = vshrl.u32 %v572_v33, 16  ;;  %v578_v2 = vshrl.u32 %v573_v30, 16 }
  0xb0   : > { %815 = vst [vmem:[%s1467_s21 + $0x30] sm:$0xff] %v1554_v6  ;;  %v1571_v12 = vmul.f32 %v1063_v1, %v410_v7  ;;  %v362_v21 = vpop.f32.mrf.mxu2  ;;  %v706_v38 = vmul.u32 9, %v705_v25  ;;  %vm768_vm6 = vcmp.lt.s32.totalorder %v1547_v3, 144  ;;  %v838_v3 = vmul.f32 %v1502_v36, %v1502_v36 }
  0xb1   : > { %v373_v15 = vrot.slane %v362_v21, 1  ;;  %vm579_vm11 = vc.u32 %v571_v44, %v575_v49  ;;  %v581_v55 = vadd.s32 %v575_v49, %v571_v44  ;;  %v427_v56 = vpop.f32.mrf.mxu3 }
  0xb2   : > { %811 = vst [vmem:[%s1467_s21 + $0x10] sm:$0xff] %v1571_v12  ;;  %v350_v24 = vpop.f32.mrf.mxu0  ;;  %v707_v47 = vsub.s32 %v1451_v22, %v706_v38  ;;  %v580_v22 = vsel %vm579_vm11, 1, %v1130_v37  ;;  %v819_v18 = vadd.f32 %v818_v9, %v1571_v12 }
  0xb3   : > { %v377_v26 = vsel %vm376_vm10, %v372_v50, %v373_v15  ;;  %v369_v57 = vrot.slane %v350_v24, 1  ;;  %v385_v31 = vsel %vm376_vm10, %v373_v15, %v365_v34  ;;  %v582_v60 = vadd.s32 %v580_v22, %v574_v48 }
  0xb4   : > { %v425_v35 = vadd.f32 %v424_v29, %v377_v26  ;;  %v708_v52 = vsub.s32 0, %v707_v47  ;;  %vm583_vm14 = vc.u32 %v581_v55, %v577_v54  ;;  %v428_v0 = vadd.f32 %v427_v56, %v385_v31  ;;  %v415_v29 = vpop.f32.mrf.mxu1 }
  0xb5   : > { %v381_v40 = vsel %vm376_vm10, %v368_v16, %v369_v57  ;;  %v584_v34 = vsel %vm583_vm14, 1, %v1130_v37  ;;  %v833_v37 = vmul.f32 %v1473_v42, %v1473_v42  ;;  %v380_v10 = vsel %vm376_vm10, %v369_v57, %v370_v61 }
  0xb6   : > { %v1586_v62 = vmul.f32 %v1068_v32, %v425_v35  ;;  %v413_v45 = vadd.f32 %v412_v39, %v381_v40  ;;  %v709_v58 = vsel %vm681_vm12, %v708_v52, %v707_v47  ;;  %v586_v46 = vadd.s32 %v584_v34, %v582_v60 }
  0xb7   : > { %vm718_vm15 = vcmp.ne.s32.totalorder %v709_v58, 0  ;;  %vm727_vm0 = vcmp.lt.s32.totalorder %v709_v58, 0  ;;  %v745_v59 = vadd.s32 9, %v709_v58  ;;  %v842_v14 = vadd.f32 %v834_v19, %v833_v37 }
  0xb8   : > { %816 = vst [vmem:[%s1467_s21 + $0x38] sm:$0xff] %v1586_v62  ;;  %v803_v50 = vmul.f32 %v1064_v43, %v413_v45  ;;  %vm736_vm1 = vmand %vm727_vm0, %vm718_vm15  ;;  %v587_v5 = vadd.s32 %v586_v46, %v576_v41  ;;  %v416_v27 = vadd.f32 %v415_v29, %v380_v10 }
  0xb9   : > { %v754_v16 = vsel %vm736_vm1, %v745_v59, %v709_v58 }
  0xba   : > { %812 = vst [vmem:[%s1467_s21 + $0x18] sm:$0xff] %v803_v50  ;;  %vm763_vm8 = vcmp.ne.s32.totalorder %v754_v16, 8  ;;  %v588_v1 = vadd.s32 %v587_v5, %v578_v2  ;;  %v836_v42 = vmul.f32 %v803_v50, %v803_v50  ;;  %v820_v61 = vadd.f32 %v819_v18, %v803_v50 }
  0xbb   : > { %vm781_vm12 = vmand %vm763_vm8, %vm772_vm2 }
  0xbc   : > { %v1069_v4 = vsel %vm781_vm12, 1.0, %v1131_v13  ;;  %v589_v20 = vshrl.u32 %v588_v1, 3 }
  0xbd   : > { %v808_v8 = vmul.f32 %v1069_v4, %v428_v0 }
  0xbe   : > { %v590_v7 = vmul.u32 9, %v589_v20 }
  0xbf   : > { %817 = vst [vmem:[%s1467_s21 + $0x40] sm:$0xff] %v808_v8  ;;  %v841_v40 = vmul.f32 %v808_v8, %v808_v8 }
  0xc0   : > { %v591_v63 = vsub.s32 %v1567_v11, %v590_v7  ;;  %v835_v11 = vmul.f32 %v1571_v12, %v1571_v12  ;;  %v839_v12 = vmul.f32 %v1554_v6, %v1554_v6 }
  0xc2   : > { %v592_v28 = vsub.s32 0, %v591_v63  ;;  %v843_v15 = vadd.f32 %v842_v14, %v835_v11 }
  0xc4   : > { %v593_v21 = vsel %vm565_vm7, %v592_v28, %v591_v63  ;;  %v844_v24 = vadd.f32 %v843_v15, %v836_v42 }
  0xc5   : > { %vm714_vm9 = vcmp.ne.s32.totalorder %v593_v21, 0  ;;  %vm723_vm13 = vcmp.lt.s32.totalorder %v593_v21, 0  ;;  %v741_v51 = vadd.s32 9, %v593_v21 }
  0xc6   : > { %vm732_vm5 = vmand %vm723_vm13, %vm714_vm9 }
  0xc7   : > { %v750_v53 = vsel %vm732_vm5, %v741_v51, %v593_v21 }
  0xc8   : > { %vm759_vm10 = vcmp.ne.s32.totalorder %v750_v53, 8 }
  0xc9   : > { %vm777_vm3 = vmand %vm759_vm10, %vm768_vm6 }
  0xca   : > { %v1065_v17 = vsel %vm777_vm3, 1.0, %v1131_v13  ;;  %v840_v13 = vmul.f32 %v1586_v62, %v1586_v62 }
  0xcb   : > { %v804_v23 = vmul.f32 %v1065_v17, %v416_v27 }
  0xcd   : > { %813 = vst [vmem:[%s1467_s21 + $0x20] sm:$0xff] %v804_v23  ;;  %v821_v25 = vadd.f32 %v820_v61, %v804_v23  ;;  %v837_v26 = vmul.f32 %v804_v23, %v804_v23 }
  0xcf   : > { %v822_v32 = vadd.f32 %v821_v25, %v1502_v36  ;;  %v845_v57 = vadd.f32 %v844_v24, %v837_v26 }
  0xd1   : > { %v823_v33 = vadd.f32 %v822_v32, %v1554_v6  ;;  %v846_v35 = vadd.f32 %v845_v57, %v838_v3 }
  0xd3   : > { %v824_v38 = vadd.f32 %v823_v33, %v1586_v62  ;;  %v847_v39 = vadd.f32 %v846_v35, %v839_v12 }
  0xd5   : > { %v825_v43 = vadd.f32 %v824_v38, %v808_v8  ;;  %v848_v44 = vadd.f32 %v847_v39, %v840_v13 }
  0xd7   : > { %v826_v30 = vrot.slane %v825_v43, 4  ;;  %v849_v45 = vadd.f32 %v848_v44, %v841_v40 }
  0xd9   : > { %v827_v36 = vadd.f32 %v826_v30, %v825_v43  ;;  %v850_v47 = vrot.slane %v849_v45, 4 }
  0xdb   : > { %v828_v48 = vrot.slane %v827_v36, 2  ;;  %v851_v49 = vadd.f32 %v850_v47, %v849_v45 }
  0xdd   : > { %v829_v6 = vadd.f32 %v828_v48, %v827_v36  ;;  %v852_v50 = vrot.slane %v851_v49, 2 }
  0xdf   : > { %v830_v52 = vrot.slane %v829_v6, 1  ;;  %v853_v54 = vadd.f32 %v852_v50, %v851_v49 }
  0xe1   : > { %v831_v62 = vadd.f32 %v830_v52, %v829_v6  ;;  %v854_v55 = vrot.slane %v853_v54, 1 }
  0xe3   : > { %832 = vst [vmem:[%s267_s25] sm:$0xff] %v831_v62  ;;  %v855_v31 = vadd.f32 %v854_v55, %v853_v54 }
  0xe5   : > { %856 = vst [vmem:[%s274_s28] sm:$0xff] %v855_v31 }
  0xe6 PF: > { %s15_s17 = sadd.s32 1, %s1128_s17   ;;  %s1685_s15 = smov %s1124_s16 }
  0xe7   : > { %p12_p6 = scmp.ge.s32.totalorder %s15_s17, 4   ;;  %s1686_s16 = smov %s1688_s18 }
  0xe9   :  { %14 = sbr.rel (!%p12_p6) target bundleno = 2 (0x2), region = 86 }

</bundles_post_ra>
